<compile_context>
chip_gen: v5e
topology: v5e:2x2
jax: 0.10.0
libtpu: 0.0.40
codegen_flags: <defaults>
</compile_context>

<pallas_src>
import functools

import jax
import jax.numpy as jnp
from jax.experimental import pallas as pl
from jax.experimental.pallas import tpu as pltpu


def _head_logreg_kernel(x_ref, w_ref, b_ref, o_ref):
    # x_ref: (tm, H) native dtype   w_ref: (1, H)   b_ref: (1,) f32 in SMEM
    # o_ref: (tm, 1)
    x = x_ref[...].astype(jnp.float32)              # cheap VPU cast
    w = w_ref[...].astype(jnp.float32)              # (1, H), broadcast over rows
    acc = jnp.sum(x * w, axis=-1, keepdims=True)    # VPU mul + XLU lane reduce, f32
    o_ref[...] = (acc + b_ref[0]).astype(o_ref.dtype)


def _round_up(x, m):
    return (x + m - 1) // m * m


@functools.partial(jax.jit, static_argnames=("tm", "force_pallas"))
def head_logreg(hidden_states, weight, bias, *, tm=None, force_pallas=False):
    """hidden_states: (..., H); weight: (1, H); bias: (1,). Returns (..., 1)."""
    orig_shape = hidden_states.shape
    H = orig_shape[-1]
    x = hidden_states.reshape(-1, H)
    M = x.shape[0]
    dtype = hidden_states.dtype

    # Tiny-problem fast path: per-grid-step (~0.35 us) + launch overhead
    # dwarfs a small dot, so let XLA handle it.
    if not force_pallas and M * H < (1 << 16):
        out = (x.astype(jnp.float32) @ weight.astype(jnp.float32).T
               + bias.astype(jnp.float32))
        return out.astype(dtype).reshape(*orig_shape[:-1], 1)

    dtype_bytes = jnp.dtype(dtype).itemsize
    packing = max(8, 32 // dtype_bytes)     # 8 rows f32, 16 bf16, 32 int8/fp8

    if tm is None:
        # Budget: 2x input tile (double buffer) + f32 working copy per row,
        # kept well under v7x's 64 MiB physical VMEM.
        x_budget = 32 * 1024 * 1024
        per_row_bytes = H * (2 * dtype_bytes + 4)
        tm = min(1024,
                 max(packing, x_budget // per_row_bytes),
                 _round_up(M, packing))
    tm = max(packing, (tm // packing) * packing)

    M_pad = _round_up(M, tm)
    if M_pad != M:                          # tail handling: pad, slice after
        x = jnp.pad(x, ((0, M_pad - M), (0, 0)))

    w = weight.reshape(1, H)                # keep (1, H): VPU path, no MXU
    b = bias.reshape(1).astype(jnp.float32)

    out = pl.pallas_call(
        _head_logreg_kernel,
        out_shape=jax.ShapeDtypeStruct((M_pad, 1), dtype),
        grid_spec=pltpu.PrefetchScalarGridSpec(
            num_scalar_prefetch=0,
            grid=(M_pad // tm,),
            in_specs=[
                pl.BlockSpec((tm, H), lambda i: (i, 0)),            # x row tile
                pl.BlockSpec((1, H), lambda i: (0, 0)),             # resident weight
                pl.BlockSpec(memory_space=pltpu.MemorySpace.SMEM),  # bias scalar
            ],
            out_specs=pl.BlockSpec((tm, 1), lambda i: (i, 0)),
        ),
        compiler_params=pltpu.CompilerParams(
            dimension_semantics=("parallel",),   # megacore-shardable row axis
            vmem_limit_bytes=48 * 1024 * 1024,   # > v5e's 16 MiB default,
                                                 # < v7x's 64 MiB physical
        ),
    )(x, w, b)

    if M_pad != M:
        out = out[:M]
    return out.reshape(*orig_shape[:-1], 1)


if __name__ == "__main__":
    # Small shapes consistent with the module: batch=2, seq=8, hidden=32.
    batch, seq, hidden = 2, 8, 32
    key = jax.random.PRNGKey(0)
    k_x, k_w, k_b = jax.random.split(key, 3)

    hidden_states = jax.random.normal(k_x, (batch, seq, hidden), dtype=jnp.float32)

    # Deterministic PyTorch-style uniform(-1/sqrt(H), 1/sqrt(H)) init.
    bound = 1.0 / (hidden ** 0.5)
    weight = jax.random.uniform(k_w, (1, hidden), minval=-bound, maxval=bound,
                                dtype=jnp.float32)
    bias = jax.random.uniform(k_b, (1,), minval=-bound, maxval=bound,
                              dtype=jnp.float32)

    # force_pallas=True so the Pallas kernel is exercised even at this tiny
    # demo shape (the wrapper would otherwise route to the plain-XLA path).
    out = head_logreg(hidden_states, weight, bias, force_pallas=True)
    out = jax.block_until_ready(out)

    ref = hidden_states @ weight.T + bias
    assert out.shape == (batch, seq, 1), out.shape
    assert jnp.allclose(out, ref, atol=1e-5, rtol=1e-5), "mismatch vs reference"

    # Also exercise the tail-padding path (M = 21 not a multiple of tm = 16).
    hs2 = jax.random.normal(k_x, (3, 7, hidden), dtype=jnp.float32)
    out2 = jax.block_until_ready(
        head_logreg(hs2, weight, bias, tm=16, force_pallas=True))
    ref2 = hs2 @ weight.T + bias
    assert out2.shape == (3, 7, 1), out2.shape
    assert jnp.allclose(out2, ref2, atol=1e-5, rtol=1e-5), "tail mismatch"

    print("KERNEL_OK")
</pallas_src>

<mosaic_0001>
module attributes {stable_mosaic.version = 11 : i64} {
  func.func @_head_logreg_kernel(%arg0: i32, %arg1: memref<16x32xf32, #tpu.memory_space<vmem>>, %arg2: memref<1x32xf32, #tpu.memory_space<vmem>>, %arg3: memref<1xf32, #tpu.memory_space<smem>>, %arg4: memref<16x1xf32, #tpu.memory_space<vmem>>) attributes {dimension_semantics = [#tpu.dimension_semantics<parallel>], iteration_bounds = array<i64: 1>, scalar_prefetch = 0 : i64, scratch_operands = 0 : i64, tpu.core_type = #tpu.core_type<tc>, window_params = [{transform_indices = @transform_0, window_bounds = array<i64: 16, 32>}, {pipeline_mode = #tpu.pipeline_mode<synchronous>, transform_indices = @transform_1, window_bounds = array<i64: 1, 32>}, {transform_indices = @transform_2, window_bounds = array<i64: 1>}, {transform_indices = @transform_3, window_bounds = array<i64: 16, 1>}]} {
    %c0 = arith.constant 0 : index
    %c0_0 = arith.constant 0 : index
    %0 = vector.load %arg1[%c0, %c0_0] : memref<16x32xf32, #tpu.memory_space<vmem>>, vector<16x32xf32>
    %c0_1 = arith.constant 0 : index
    %c0_2 = arith.constant 0 : index
    %1 = vector.load %arg2[%c0_1, %c0_2] : memref<1x32xf32, #tpu.memory_space<vmem>>, vector<1x32xf32>
    %2 = vector.broadcast %1 : vector<1x32xf32> to vector<16x32xf32>
    %3 = arith.mulf %0, %2 : vector<16x32xf32>
    %cst = arith.constant dense<0.000000e+00> : vector<16xf32>
    %4 = vector.multi_reduction <add>, %3, %cst [1] : vector<16x32xf32> to vector<16xf32>
    %5 = vector.shape_cast %4 : vector<16xf32> to vector<16x1xf32>
    %c0_3 = arith.constant 0 : index
    %6 = memref.load %arg3[%c0_3] : memref<1xf32, #tpu.memory_space<smem>>
    %7 = vector.broadcast %6 : f32 to vector<16x1xf32>
    %8 = arith.addf %5, %7 : vector<16x1xf32>
    %c0_4 = arith.constant 0 : index
    %c0_5 = arith.constant 0 : index
    %9 = vector.load %arg4[%c0_4, %c0_5] : memref<16x1xf32, #tpu.memory_space<vmem>>, vector<16x1xf32>
    tpu.vector_store %arg4[%c0_4, %c0_5], %8 {strides = array<i32>} : memref<16x1xf32, #tpu.memory_space<vmem>>, vector<16x1xf32>,
    return
  }
  func.func @transform_0(%arg0: i32) -> (i32, i32) {
    %c0_i32 = arith.constant 0 : i32
    %c0_i32_0 = arith.constant 0 : i32
    return %arg0, %c0_i32 : i32, i32
  }
  func.func @transform_1(%arg0: i32) -> (i32, i32) {
    %c0_i32 = arith.constant 0 : i32
    %c0_i32_0 = arith.constant 0 : i32
    %c0_i32_1 = arith.constant 0 : i32
    return %c0_i32, %c0_i32_0 : i32, i32
  }
  func.func @transform_2(%arg0: i32) -> i32 {
    %c0_i32 = arith.constant 0 : i32
    %c0_i32_0 = arith.constant 0 : i32
    return %c0_i32 : i32
  }
  func.func @transform_3(%arg0: i32) -> (i32, i32) {
    %c0_i32 = arith.constant 0 : i32
    %c0_i32_0 = arith.constant 0 : i32
    return %arg0, %c0_i32 : i32, i32
  }
}

</mosaic_0001>

<bundles_post_ra>
// kernel: head_logreg.1
= control target key start
LH: loop header
LB: loop body
LE: loop exit
PB: predicated region body
PF: predicated region fallthrough
CT: control target
= control target key end

     0   :  { %9 = vsyncpa [#allocation4], 0  ;;  %s88_s15 = smov [#allocation3]   ;;  %s89_s17 = smov 128   ;;  %s126_s0 = inlined_call_operand.hbm [shape: f32[16,32], index: 0, kind: input, shape index: {}]   ;;  %s127_s1 = inlined_call_operand.vmem [shape: f32[1,32], index: 1, kind: input, shape index: {}]   ;;  %s128_s2 = inlined_call_operand.<no memory space> [shape: f32[1], index: 2, kind: input, shape index: {}]   ;;  %s129_s3 = inlined_call_operand.vmem [shape: f32[16,1], index: 3, kind: output, shape index: {}]  }
   0x1   :  { %s14_s14 = sshll.u32 %s126_s0, 4  ;;  %s16_s16 = sshll.u32 %s88_s15, 4  ;;  %s15_s14 = int_to_ptr.hbm [resolvable:$true] %s14_s14  ;;  %s17_s16 = int_to_ptr.vmem [resolvable:$true] %s16_s16 }
   0x2   :  { %s90_s18 = smov 8  }
   0x3   :  { %22 = dma.hbm_to_vmem [thread:$0]  %s15_s14, 256, %s17_s16, [#allocation4], %s89_s17, %s89_s17, %s90_s18  }
   0x4   :  { %86 = dma.done.wait [#allocation4], 256  }
   0x5   :  { %87 = vsyncadd [#allocation4], 4294967040  ;;  %v31_v0 = vld [vmem:[#allocation3] sm:$0xff]  ;;  %vm39_vm0 = vcmask 261120   ;;  %v32_v3 = vld [vmem:[#allocation3 + $0x8] sm:$0xff]  ;;  %v47_v7 = vstv %s128_s2  ;;  %vm50_vm1 = vcmask 7168  }
   0x6   :  { %v61_v1 = vld [vmem:[%s127_s1] ss:$0 sm:$0xff] }
   0x7   :  { %v37_v2 = vmul.f32 %v61_v1, %v31_v0  ;;  %v38_v5 = vmul.f32 %v61_v1, %v32_v3 }
   0x9   :  { %v40_v4 = vsel %vm39_vm0, %v37_v2, 0.0  ;;  %v43_v6 = vsel %vm39_vm0, %v38_v5, 0.0 }
   0xa   :  { %41 = vadd.xlane.f32.xlu0 %v40_v4 }
  0x12   :  { %44 = vadd.xlane.f32.xlu0 %v43_v6 }
  0x7d   :  { %v42_v8 = vpop.xlane.xlu0 %41 }
  0x7e   :  { %v48_v9 = vadd.f32 %v47_v7, %v42_v8 }
  0x80   :  { %51 = vst.msk [vmem:[%s129_s3] sm:$0xff] %vm50_vm1, %v48_v9 }
  0x85   :  { %v45_v10 = vpop.xlane.xlu0 %44 }
  0x86   :  { %v49_v11 = vadd.f32 %v47_v7, %v45_v10 }
  0x88   :  { %52 = vst.msk [vmem:[%s129_s3 + $0x8] sm:$0xff] %vm50_vm1, %v49_v11 }
  0x89   :  { %57 = vsyncpa [#allocation4], 1 }

</bundles_post_ra>
